<compile_context>
chip_gen: v7x
topology: tpu7x:2x2x1
jax: 0.10.0
libtpu: 0.0.40
codegen_flags: <defaults>
</compile_context>

<pallas_src>
import math

import jax
import jax.numpy as jnp
from jax.experimental import pallas as pl
from jax.experimental.pallas import tpu as pltpu


def _softplus(x):
    # Matches torch.nn.Softplus(beta=1, threshold=20)
    return jnp.where(x > 20.0, x, jnp.log1p(jnp.exp(jnp.minimum(x, 20.0))))


def mlp_value_kernel(x_ref,
                     w1_ref, b1_ref,
                     w2_ref, b2_ref,
                     w3_ref, b3_ref,
                     wvt_ref, bv_ref,
                     o_ref):
    """One batch-tile of the fused forward pass.

    x_ref: (TB, F) bf16 tile; w* bf16; biases f32; wvt: (out_dim, H3) f32.
    Dots accumulate in f32 (preferred_element_type); elementwise math is f32.
    """
    h = jnp.dot(x_ref[...], w1_ref[...], preferred_element_type=jnp.float32)
    h = jnp.maximum(h + b1_ref[...], 0.0)
    h = jnp.dot(h.astype(jnp.bfloat16), w2_ref[...],
                preferred_element_type=jnp.float32)
    h = jnp.maximum(h + b2_ref[...], 0.0)
    h = jnp.dot(h.astype(jnp.bfloat16), w3_ref[...],
                preferred_element_type=jnp.float32)
    h = jnp.maximum(h + b3_ref[...], 0.0)

    out_dim = wvt_ref.shape[0]
    if out_dim == 1:
        # N=1 head: MXU would be <1% utilized -> VPU multiply + XLU lane reduce.
        v = jnp.sum(h * wvt_ref[...], axis=-1, keepdims=True) + bv_ref[...]
    else:
        # General head: contract hidden dim of h with hidden dim of wvt (NT matmul).
        v = jax.lax.dot_general(
            h.astype(jnp.bfloat16), wvt_ref[...].astype(jnp.bfloat16),
            (((1,), (1,)), ((), ())),
            preferred_element_type=jnp.float32) + bv_ref[...]

    o_ref[...] = _softplus(v)


def model_forward(x, params, *, tile_b=512):
    """x: [B, state_stack, input_dim] (or already [B, F]); returns [B, output_dim]."""
    B = x.shape[0]
    x2 = jnp.reshape(x, (B, -1)).astype(jnp.float32)   # x.view(B, -1)
    F = x2.shape[1]
    H1 = params["w1"].shape[1]
    H2 = params["w2"].shape[1]
    H3 = params["w3"].shape[1]
    out_dim = params["bv"].shape[-1]

    # Batch tile: multiple of 8 (f32/bf16 sublane rule), capped at tile_b.
    if B >= tile_b:
        TB = tile_b
    else:
        TB = max(8, -(-B // 8) * 8)
    B_pad = -(-B // TB) * TB
    if B_pad != B:
        x2 = jnp.pad(x2, ((0, B_pad - B), (0, 0)))

    # bf16 dot operands at the boundary; biases stay f32.
    x_bf = x2.astype(jnp.bfloat16)
    w1 = params["w1"].astype(jnp.bfloat16)
    w2 = params["w2"].astype(jnp.bfloat16)
    w3 = params["w3"].astype(jnp.bfloat16)
    wvt = jnp.transpose(params["wv"])                   # (out_dim, H3), f32

    const = lambda i: (0, 0)                            # weights resident across grid
    out = pl.pallas_call(
        mlp_value_kernel,
        out_shape=jax.ShapeDtypeStruct((B_pad, out_dim), jnp.float32),
        grid=(B_pad // TB,),
        in_specs=[
            pl.BlockSpec((TB, F), lambda i: (i, 0)),    # x: tiled over batch
            pl.BlockSpec((F, H1), const),
            pl.BlockSpec((1, H1), const),
            pl.BlockSpec((H1, H2), const),
            pl.BlockSpec((1, H2), const),
            pl.BlockSpec((H2, H3), const),
            pl.BlockSpec((1, H3), const),
            pl.BlockSpec((out_dim, H3), const),
            pl.BlockSpec((1, out_dim), const),
        ],
        out_specs=pl.BlockSpec((TB, out_dim), lambda i: (i, 0)),
        compiler_params=pltpu.CompilerParams(
            dimension_semantics=("parallel",)),
    )(x_bf, w1, params["b1"], w2, params["b2"], w3, params["b3"], wvt, params["bv"])

    return out[:B]


def init_params(key, in_features, architecture, output_dim):
    """Deterministic init mimicking torch.nn.Linear default (U(-1/sqrt(fan_in), 1/sqrt(fan_in)))."""
    dims = [in_features] + list(architecture)
    params = {}
    keys = jax.random.split(key, 2 * (len(architecture) + 1))
    ki = 0
    # Base layers
    for li in range(len(architecture)):
        fan_in, fan_out = dims[li], dims[li + 1]
        bound = 1.0 / math.sqrt(fan_in)
        params[f"w{li + 1}"] = jax.random.uniform(
            keys[ki], (fan_in, fan_out), jnp.float32, -bound, bound); ki += 1
        params[f"b{li + 1}"] = jax.random.uniform(
            keys[ki], (1, fan_out), jnp.float32, -bound, bound); ki += 1
    # Value head
    fan_in = architecture[-1]
    bound = 1.0 / math.sqrt(fan_in)
    params["wv"] = jax.random.uniform(
        keys[ki], (fan_in, output_dim), jnp.float32, -bound, bound); ki += 1
    params["bv"] = jax.random.uniform(
        keys[ki], (1, output_dim), jnp.float32, -bound, bound); ki += 1
    return params


def reference_forward(x, params):
    """Pure-JAX f32 reference for correctness check."""
    B = x.shape[0]
    h = jnp.reshape(x, (B, -1)).astype(jnp.float32)
    h = jnp.maximum(h @ params["w1"] + params["b1"], 0.0)
    h = jnp.maximum(h @ params["w2"] + params["b2"], 0.0)
    h = jnp.maximum(h @ params["w3"] + params["b3"], 0.0)
    v = h @ params["wv"] + params["bv"]
    return _softplus(v)


if __name__ == "__main__":
    # Small, module-consistent shapes: state_stack=4, input_dim=11 -> F=44
    state_stack, input_dim, output_dim = 4, 11, 1
    architecture = [256, 128, 64]

    key = jax.random.PRNGKey(0)
    k_x, k_p, k_x2 = jax.random.split(key, 3)
    params = init_params(k_p, state_stack * input_dim, architecture, output_dim)

    # Test 1: tiny batch (pads to one 8-row tile).
    batch = 2
    x = jax.random.normal(k_x, (batch, state_stack, input_dim), jnp.float32)
    out = jax.block_until_ready(model_forward(x, params))
    ref = reference_forward(x, params)
    assert out.shape == (batch, output_dim), out.shape
    assert jnp.allclose(out, ref, atol=3e-2, rtol=3e-2), (out, ref)

    # Test 2: multi-tile grid with a padded tail (exercises pipelining + tail mask).
    batch2 = 1100   # TB=512 -> B_pad=1536, grid=(3,)
    x2 = jax.random.normal(k_x2, (batch2, state_stack, input_dim), jnp.float32)
    out2 = jax.block_until_ready(model_forward(x2, params))
    ref2 = reference_forward(x2, params)
    assert out2.shape == (batch2, output_dim), out2.shape
    assert jnp.allclose(out2, ref2, atol=3e-2, rtol=3e-2)

    print("KERNEL_OK")
</pallas_src>

<mosaic_0001>
module attributes {stable_mosaic.version = 11 : i64} {
  func.func @mlp_value_kernel(%arg0: i32, %arg1: memref<8x44xbf16, #tpu.memory_space<vmem>>, %arg2: memref<44x256xbf16, #tpu.memory_space<vmem>>, %arg3: memref<1x256xf32, #tpu.memory_space<vmem>>, %arg4: memref<256x128xbf16, #tpu.memory_space<vmem>>, %arg5: memref<1x128xf32, #tpu.memory_space<vmem>>, %arg6: memref<128x64xbf16, #tpu.memory_space<vmem>>, %arg7: memref<1x64xf32, #tpu.memory_space<vmem>>, %arg8: memref<1x64xf32, #tpu.memory_space<vmem>>, %arg9: memref<1x1xf32, #tpu.memory_space<vmem>>, %arg10: memref<8x1xf32, #tpu.memory_space<vmem>>) attributes {dimension_semantics = [#tpu.dimension_semantics<parallel>], iteration_bounds = array<i64: 1>, scalar_prefetch = 0 : i64, scratch_operands = 0 : i64, tpu.core_type = #tpu.core_type<tc>, window_params = [{transform_indices = @transform_0, window_bounds = array<i64: 8, 44>}, {pipeline_mode = #tpu.pipeline_mode<synchronous>, transform_indices = @transform_1, window_bounds = array<i64: 44, 256>}, {pipeline_mode = #tpu.pipeline_mode<synchronous>, transform_indices = @transform_2, window_bounds = array<i64: 1, 256>}, {pipeline_mode = #tpu.pipeline_mode<synchronous>, transform_indices = @transform_3, window_bounds = array<i64: 256, 128>}, {pipeline_mode = #tpu.pipeline_mode<synchronous>, transform_indices = @transform_4, window_bounds = array<i64: 1, 128>}, {pipeline_mode = #tpu.pipeline_mode<synchronous>, transform_indices = @transform_5, window_bounds = array<i64: 128, 64>}, {pipeline_mode = #tpu.pipeline_mode<synchronous>, transform_indices = @transform_6, window_bounds = array<i64: 1, 64>}, {pipeline_mode = #tpu.pipeline_mode<synchronous>, transform_indices = @transform_7, window_bounds = array<i64: 1, 64>}, {pipeline_mode = #tpu.pipeline_mode<synchronous>, transform_indices = @transform_8, window_bounds = array<i64: 1, 1>}, {transform_indices = @transform_9, window_bounds = array<i64: 8, 1>}]} {
    %c0 = arith.constant 0 : index
    %c0_0 = arith.constant 0 : index
    %0 = vector.load %arg1[%c0, %c0_0] : memref<8x44xbf16, #tpu.memory_space<vmem>>, vector<8x44xbf16>
    %c0_1 = arith.constant 0 : index
    %c0_2 = arith.constant 0 : index
    %1 = vector.load %arg2[%c0_1, %c0_2] : memref<44x256xbf16, #tpu.memory_space<vmem>>, vector<44x256xbf16>
    %cst = arith.constant dense<0.000000e+00> : vector<8x256xf32>
    %2 = tpu.matmul %0, %1, %cst {dimension_numbers = #tpu.dot_dimension_numbers<[1], [0], [0], [1], [0, 0, 1, 1], [], []>} : vector<8x44xbf16>, vector<44x256xbf16>, vector<8x256xf32> -> vector<8x256xf32>
    %c0_3 = arith.constant 0 : index
    %c0_4 = arith.constant 0 : index
    %3 = vector.load %arg3[%c0_3, %c0_4] : memref<1x256xf32, #tpu.memory_space<vmem>>, vector<1x256xf32>
    %4 = vector.broadcast %3 : vector<1x256xf32> to vector<8x256xf32>
    %5 = arith.addf %2, %4 : vector<8x256xf32>
    %cst_5 = arith.constant 0.000000e+00 : f32
    %6 = vector.broadcast %cst_5 : f32 to vector<8x256xf32>
    %7 = arith.maximumf %5, %6 : vector<8x256xf32>
    %8 = arith.truncf %7 : vector<8x256xf32> to vector<8x256xbf16>
    %c0_6 = arith.constant 0 : index
    %c0_7 = arith.constant 0 : index
    %9 = vector.load %arg4[%c0_6, %c0_7] : memref<256x128xbf16, #tpu.memory_space<vmem>>, vector<256x128xbf16>
    %cst_8 = arith.constant dense<0.000000e+00> : vector<8x128xf32>
    %10 = tpu.matmul %8, %9, %cst_8 {dimension_numbers = #tpu.dot_dimension_numbers<[1], [0], [0], [1], [0, 0, 1, 1], [], []>} : vector<8x256xbf16>, vector<256x128xbf16>, vector<8x128xf32> -> vector<8x128xf32>
    %c0_9 = arith.constant 0 : index
    %c0_10 = arith.constant 0 : index
    %11 = vector.load %arg5[%c0_9, %c0_10] : memref<1x128xf32, #tpu.memory_space<vmem>>, vector<1x128xf32>
    %12 = vector.broadcast %11 : vector<1x128xf32> to vector<8x128xf32>
    %13 = arith.addf %10, %12 : vector<8x128xf32>
    %cst_11 = arith.constant 0.000000e+00 : f32
    %14 = vector.broadcast %cst_11 : f32 to vector<8x128xf32>
    %15 = arith.maximumf %13, %14 : vector<8x128xf32>
    %16 = arith.truncf %15 : vector<8x128xf32> to vector<8x128xbf16>
    %c0_12 = arith.constant 0 : index
    %c0_13 = arith.constant 0 : index
    %17 = vector.load %arg6[%c0_12, %c0_13] : memref<128x64xbf16, #tpu.memory_space<vmem>>, vector<128x64xbf16>
    %cst_14 = arith.constant dense<0.000000e+00> : vector<8x64xf32>
    %18 = tpu.matmul %16, %17, %cst_14 {dimension_numbers = #tpu.dot_dimension_numbers<[1], [0], [0], [1], [0, 0, 1, 1], [], []>} : vector<8x128xbf16>, vector<128x64xbf16>, vector<8x64xf32> -> vector<8x64xf32>
    %c0_15 = arith.constant 0 : index
    %c0_16 = arith.constant 0 : index
    %19 = vector.load %arg7[%c0_15, %c0_16] : memref<1x64xf32, #tpu.memory_space<vmem>>, vector<1x64xf32>
    %20 = vector.broadcast %19 : vector<1x64xf32> to vector<8x64xf32>
    %21 = arith.addf %18, %20 : vector<8x64xf32>
    %cst_17 = arith.constant 0.000000e+00 : f32
    %22 = vector.broadcast %cst_17 : f32 to vector<8x64xf32>
    %23 = arith.maximumf %21, %22 : vector<8x64xf32>
    %c0_18 = arith.constant 0 : index
    %c0_19 = arith.constant 0 : index
    %24 = vector.load %arg8[%c0_18, %c0_19] : memref<1x64xf32, #tpu.memory_space<vmem>>, vector<1x64xf32>
    %25 = vector.broadcast %24 : vector<1x64xf32> to vector<8x64xf32>
    %26 = arith.mulf %23, %25 : vector<8x64xf32>
    %cst_20 = arith.constant dense<0.000000e+00> : vector<8xf32>
    %27 = vector.multi_reduction <add>, %26, %cst_20 [1] : vector<8x64xf32> to vector<8xf32>
    %28 = vector.shape_cast %27 : vector<8xf32> to vector<8x1xf32>
    %c0_21 = arith.constant 0 : index
    %c0_22 = arith.constant 0 : index
    %29 = vector.load %arg9[%c0_21, %c0_22] : memref<1x1xf32, #tpu.memory_space<vmem>>, vector<1x1xf32>
    %30 = vector.broadcast %29 : vector<1x1xf32> to vector<8x1xf32>
    %31 = arith.addf %28, %30 : vector<8x1xf32>
    %cst_23 = arith.constant 2.000000e+01 : f32
    %32 = vector.broadcast %cst_23 : f32 to vector<8x1xf32>
    %33 = arith.cmpf ogt, %31, %32 : vector<8x1xf32>
    %cst_24 = arith.constant 2.000000e+01 : f32
    %34 = vector.broadcast %cst_24 : f32 to vector<8x1xf32>
    %35 = arith.minimumf %31, %34 : vector<8x1xf32>
    %36 = math.exp %35 : vector<8x1xf32>
    %37 = math.log1p %36 : vector<8x1xf32>
    %38 = arith.select %33, %31, %37 : vector<8x1xi1>, vector<8x1xf32>
    %c0_25 = arith.constant 0 : index
    %c0_26 = arith.constant 0 : index
    %39 = vector.load %arg10[%c0_25, %c0_26] : memref<8x1xf32, #tpu.memory_space<vmem>>, vector<8x1xf32>
    tpu.vector_store %arg10[%c0_25, %c0_26], %38 {strides = array<i32>} : memref<8x1xf32, #tpu.memory_space<vmem>>, vector<8x1xf32>,
    return
  }
  func.func @transform_0(%arg0: i32) -> (i32, i32) {
    %c0_i32 = arith.constant 0 : i32
    %c0_i32_0 = arith.constant 0 : i32
    return %arg0, %c0_i32 : i32, i32
  }
  func.func @transform_1(%arg0: i32) -> (i32, i32) {
    %c0_i32 = arith.constant 0 : i32
    %c0_i32_0 = arith.constant 0 : i32
    %c0_i32_1 = arith.constant 0 : i32
    return %c0_i32, %c0_i32_0 : i32, i32
  }
  func.func @transform_2(%arg0: i32) -> (i32, i32) {
    %c0_i32 = arith.constant 0 : i32
    %c0_i32_0 = arith.constant 0 : i32
    %c0_i32_1 = arith.constant 0 : i32
    return %c0_i32, %c0_i32_0 : i32, i32
  }
  func.func @transform_3(%arg0: i32) -> (i32, i32) {
    %c0_i32 = arith.constant 0 : i32
    %c0_i32_0 = arith.constant 0 : i32
    %c0_i32_1 = arith.constant 0 : i32
    return %c0_i32, %c0_i32_0 : i32, i32
  }
  func.func @transform_4(%arg0: i32) -> (i32, i32) {
    %c0_i32 = arith.constant 0 : i32
    %c0_i32_0 = arith.constant 0 : i32
    %c0_i32_1 = arith.constant 0 : i32
    return %c0_i32, %c0_i32_0 : i32, i32
  }
  func.func @transform_5(%arg0: i32) -> (i32, i32) {
    %c0_i32 = arith.constant 0 : i32
    %c0_i32_0 = arith.constant 0 : i32
    %c0_i32_1 = arith.constant 0 : i32
    return %c0_i32, %c0_i32_0 : i32, i32
  }
  func.func @transform_6(%arg0: i32) -> (i32, i32) {
    %c0_i32 = arith.constant 0 : i32
    %c0_i32_0 = arith.constant 0 : i32
    %c0_i32_1 = arith.constant 0 : i32
    return %c0_i32, %c0_i32_0 : i32, i32
  }
  func.func @transform_7(%arg0: i32) -> (i32, i32) {
    %c0_i32 = arith.constant 0 : i32
    %c0_i32_0 = arith.constant 0 : i32
    %c0_i32_1 = arith.constant 0 : i32
    return %c0_i32, %c0_i32_0 : i32, i32
  }
  func.func @transform_8(%arg0: i32) -> (i32, i32) {
    %c0_i32 = arith.constant 0 : i32
    %c0_i32_0 = arith.constant 0 : i32
    %c0_i32_1 = arith.constant 0 : i32
    return %c0_i32, %c0_i32_0 : i32, i32
  }
  func.func @transform_9(%arg0: i32) -> (i32, i32) {
    %c0_i32 = arith.constant 0 : i32
    %c0_i32_0 = arith.constant 0 : i32
    return %arg0, %c0_i32 : i32, i32
  }
}

</mosaic_0001>

<bundles_post_ra>
// kernel: tpu_custom_call.1
= control target key start
LH: loop header
LB: loop body
LE: loop exit
PB: predicated region body
PF: predicated region fallthrough
CT: control target
= control target key end

     0   :  { %s767_s0 = inlined_call_operand.vmem [shape: bf16[8,44], index: 0, kind: input, shape index: {}]   ;;  %s768_s1 = inlined_call_operand.vmem [shape: bf16[44,256], index: 1, kind: input, shape index: {}]   ;;  %s769_s2 = inlined_call_operand.vmem [shape: f32[1,256], index: 2, kind: input, shape index: {}]   ;;  %s770_s3 = inlined_call_operand.hbm [shape: bf16[256,128], index: 3, kind: input, shape index: {}]   ;;  %s771_s4 = inlined_call_operand.vmem [shape: f32[1,128], index: 4, kind: input, shape index: {}]   ;;  %s772_s5 = inlined_call_operand.vmem [shape: bf16[128,64], index: 5, kind: input, shape index: {}]   ;;  %s773_s6 = inlined_call_operand.vmem [shape: f32[1,64], index: 6, kind: input, shape index: {}]   ;;  %s774_s7 = inlined_call_operand.vmem [shape: f32[1,64], index: 7, kind: input, shape index: {}]   ;;  %s775_s8 = inlined_call_operand.<no memory space> [shape: f32[1,1], index: 8, kind: input, shape index: {}]   ;;  %s776_s9 = inlined_call_operand.vmem [shape: f32[8,1], index: 9, kind: output, shape index: {}]  }
   0x1   :  { %v14_v0 = vstv %s775_s8 }
   0x2   :  { %15 = vst [vmem:[#allocation2] sm:$0x1] %v14_v0 }
   0x3   :  { %16 = vsyncpa [#allocation4], 0  ;;  %s636_s11 = smov [#allocation3]   ;;  %s612_s15 = scalar_lea.hbm %s770_s3, 2048 }
   0x4   :  { %s28_s12 = sshll.u32 %s636_s11, 4  ;;  %p613_p0 = scmp.ne.s32.totalorder %s770_s3, %s612_s15  ;;  %s29_s12 = int_to_ptr.vmem [resolvable:$true] %s28_s12 }
   0x5   :  { %p616_p1 = scmp.lt.u32.totalorder %s612_s15, %s770_s3 }
   0x7   :  { %p618_p2 = pnand %p616_p1, %p613_p0 }
   0x9   :  { %621 = shalt.err (!%p618_p2)
}
   0xa   :  { %s622_s8 = scalar_lea.vmem %s29_s12, 2048  ;;  %p627_p4 = scmp.lt.s32.totalorder %s29_s12, %s29_s12 }
   0xb   :  { %p623_p3 = scmp.ne.s32.totalorder %s29_s12, %s622_s8  ;;  %p628_p5 = scmp.lt.s32.totalorder %s622_s8, %s622_s8 }
   0xd   :  { %p629_p6 = por %p628_p5, %p627_p4 }
   0xf   :  { %p630_p7 = pnand %p629_p6, %p623_p3 }
  0x11   :  { %633 = shalt.err (!%p630_p7)
}
  0x12   :  { %s637_s20 = smov 64   ;;  %s638_s21 = smov 4  }
  0x13   :  { %34 = dma.hbm_to_vmem [thread:$0]  %s770_s3, 2048, %s29_s12, [#allocation4], %s637_s20, %s637_s20, %s638_s21  }
  0x14   :  { %634 = dma.done.wait [#allocation4], 2048  }
  0x15   :  { %635 = vsyncadd [#allocation4], 4294965248  ;;  %v639_v1 = vmov 0   ;;  %v575_v2 = vld [vmem:[%s768_s1 + $0x4] ss:$8 sps:$4 sm:$0xff]   ;;  %vm100_vm0 = vcmask 1045504   ;;  %v58_v33 = vlaneseq }
  0x16   :  { %139 = vmatprep.mubr.bf16.mxu0 %v639_v1  ;;  %v577_v3 = vld [vmem:[%s768_s1] ss:$8 sps:$4 sm:$0xff]   ;;  %107 = vmatprep.subr.bf16.mxu0 %v575_v2  ;;  %v578_v4 = vld [vmem:[%s768_s1 + $0x14] ss:$8 sps:$4 sm:$0xff]   ;;  %v580_v5 = vld [vmem:[%s768_s1 + $0x10] ss:$8 sps:$4 sm:$0xff]  }
  0x17   :  { %108 = vmatpush1.bf16.msra.mxu0 %v577_v3  ;;  %v581_v6 = vld [vmem:[%s768_s1 + $0x24] ss:$8 sps:$4 sm:$0x3f]   ;;  %v583_v8 = vld [vmem:[%s768_s1 + $0x20] ss:$8 sps:$4 sm:$0x3f]  }
  0x18   :  { %v584_v7 = vld [vmem:[#allocation3 + $0x40] sm:$0xff]   ;;  %109 = vmatprep.subr.bf16.mxu0 %v578_v4  ;;  %v586_v10 = vld [vmem:[#allocation3 + $0x48] sm:$0xff]   ;;  %v102_v11 = vsel %vm100_vm0, %v583_v8, 0  ;;  %v588_v14 = vld [vmem:[#allocation3 + $0x50] sm:$0xff]   ;;  %vm96_vm1 = vcmask 359424   ;;  %v640_v27 = vmov 0.0  }
  0x19   :  { %v585_v9 = vld [vmem:[#allocation3] sm:$0xff]   ;;  %518 = vmatprep.subr.bf16.mxu1 %v584_v7  ;;  %v587_v12 = vld [vmem:[#allocation3 + $0x8] sm:$0xff]   ;;  %v589_v15 = vld [vmem:[#allocation3 + $0x10] sm:$0xff]   ;;  %v59_v34 = vshrl.u32 %v58_v33, 7  ;;  %vm641_vm2 = vmmov 0   ;;  %vm449_vm3 = vcmask 523264  }
  0x1a   :  { %519 = vmatpush3.bf16.msra.mxu1 %v585_v9  ;;  %v49_v13 = vld [vmem:[%s767_s0] sm:$0xf]  ;;  %v594_v20 = vld [vmem:[#allocation3 + $0x68] sm:$0xff]   ;;  %v596_v22 = vld [vmem:[#allocation3 + $0x70] sm:$0xff]   ;;  %vm475_vm5 = vcmask 7168  }
  0x1b   :  { %110 = vmatpush1.bf16.msra.mxu0 %v580_v5  ;;  %520 = vmatprep.subr.bf16.mxu1 %v586_v10  ;;  %v590_v16 = vld [vmem:[#allocation3 + $0x58] sm:$0xff]   ;;  %v592_v18 = vld [vmem:[#allocation3 + $0x60] sm:$0xff]   ;;  %v595_v21 = vld [vmem:[#allocation3 + $0x28] sm:$0xff]   ;;  %v60_v35 = vsub.s32 0, %v59_v34  ;;  %v64_v37 = vsub.s32 1, %v59_v34 }
  0x1c   :  { %488 = vmatprep.subr.msk.bf16.mxu0 %vm100_vm0, %v581_v6  ;;  %v591_v17 = vld [vmem:[#allocation3 + $0x18] sm:$0xff]   ;;  %v593_v19 = vld [vmem:[#allocation3 + $0x20] sm:$0xff]   ;;  %v597_v23 = vld [vmem:[#allocation3 + $0x30] sm:$0xff]  }
  0x1d   :  { %v598_v24 = vld [vmem:[#allocation3 + $0x78] sm:$0xff]   ;;  %v601_v28 = vld [vmem:[%s772_s5 + $0x8] sm:$0xff]   ;;  %v602_v29 = vld [vmem:[%s772_s5 + $0x10] sm:$0xff]  }
  0x1e   :  { %521 = vmatpush3.bf16.msra.mxu1 %v587_v12  ;;  %v599_v25 = vld [vmem:[#allocation3 + $0x38] sm:$0xff]   ;;  %v605_v32 = vld [vmem:[%s772_s5 + $0x28] sm:$0xff]   ;;  %v606_v50 = vld [vmem:[%s772_s5 + $0x30] sm:$0xff]  }
  0x1f   :  { %112 = vmatpush1.bf16.msra.mxu0 %v102_v11  ;;  %522 = vmatprep.subr.bf16.mxu1 %v588_v14  ;;  %v600_v26 = vld [vmem:[%s772_s5] sm:$0xff]   ;;  %v603_v30 = vld [vmem:[%s772_s5 + $0x18] sm:$0xff]  }
  0x20   :  { %549 = vmatprep.subr.bf16.mxu0 %v640_v27  ;;  %v604_v31 = vld [vmem:[%s772_s5 + $0x20] sm:$0xff]   ;;  %v607_v51 = vld [vmem:[%s772_s5 + $0x38] sm:$0xff]  }
  0x21   :  { %v56_v36 = vld [vmem:[%s769_s2] sm:$0x3] }
  0x22   :  { %489 = vmatmul.mubr.msk.bf16.vlgmr.msra.gmra.mrb[0].mxu0 %vm96_vm1, %v49_v13  ;;  %523 = vmatpush3.bf16.msra.mxu1 %v589_v15  ;;  %v61_v38 = vrot.slane %v56_v36, %v60_v35  ;;  %v65_v39 = vrot.slane %v56_v36, %v64_v37  ;;  %v490_v53 = vld [vmem:[%s771_s4] ss:$0 sm:$0xff] }
  0x23   :  { %524 = vmatprep.subr.bf16.mxu1 %v590_v16  ;;  %550 = vmatpush3.bf16.msra.mxu0 %v600_v26  ;;  %v507_v61 = vld [vmem:[%s773_s6] ss:$0 sm:$0xff] }
  0x24   :  { %551 = vmatprep.subr.bf16.mxu0 %v640_v27  ;;  %565 = vmatprep.mubr.msk.bf16.mxu0 %vm641_vm2, %v640_v27  ;;  %v516_v2 = vld [vmem:[%s774_s7] ss:$0 sm:$0xff] }
  0x25   :  { %v517_v7 = vld [vmem:[#allocation2] ss:$0 sm:$0xff] }
  0x26   :  { %525 = vmatpush3.bf16.msra.mxu1 %v591_v17 }
  0x27   :  { %526 = vmatprep.subr.bf16.mxu1 %v592_v18  ;;  %552 = vmatpush3.bf16.msra.mxu0 %v601_v28 }
  0x28   :  { %553 = vmatprep.subr.bf16.mxu0 %v640_v27 }
  0x2a   :  { %527 = vmatpush3.bf16.msra.mxu1 %v593_v19 }
  0x2b   :  { %528 = vmatprep.subr.bf16.mxu1 %v594_v20  ;;  %554 = vmatpush3.bf16.msra.mxu0 %v602_v29 }
  0x2c   :  { %555 = vmatprep.subr.bf16.mxu0 %v640_v27 }
  0x2e   :  { %529 = vmatpush3.bf16.msra.mxu1 %v595_v21 }
  0x2f   :  { %530 = vmatprep.subr.bf16.mxu1 %v596_v22  ;;  %556 = vmatpush3.bf16.msra.mxu0 %v603_v30 }
  0x30   :  { %557 = vmatprep.subr.bf16.mxu0 %v640_v27 }
  0x32   :  { %531 = vmatpush3.bf16.msra.mxu1 %v597_v23 }
  0x33   :  { %532 = vmatprep.subr.bf16.mxu1 %v598_v24  ;;  %558 = vmatpush3.bf16.msra.mxu0 %v604_v31 }
  0x34   :  { %559 = vmatprep.subr.bf16.mxu0 %v640_v27 }
  0x36   :  { %533 = vmatpush3.bf16.msra.mxu1 %v599_v25 }
  0x37   :  { %560 = vmatpush3.bf16.msra.mxu0 %v605_v32 }
  0x38   :  { %561 = vmatprep.subr.bf16.mxu0 %v640_v27 }
  0x3b   :  { %562 = vmatpush3.bf16.msra.mxu0 %v606_v50 }
  0x3c   :  { %563 = vmatprep.subr.bf16.mxu0 %v640_v27 }
  0x3f   :  { %564 = vmatpush3.bf16.msra.mxu0 %v607_v51 }
  0xf5   :  { %v141_v40 = vpop.f32.mrb[0].mxu0 }
  0xf6   :  { %v142_v41 = vadd.f32 %v141_v40, %v61_v38  ;;  %v143_v42 = vpop.f32.mrb[1].mxu0 }
  0xf7   :  { %v144_v43 = vadd.f32 %v143_v42, %v65_v39  ;;  %v145_v44 = vpop.f32.mrb[2].mxu0 }
  0xf8   :  { %v148_v45 = vmax.f32 %v142_v41, 0.0  ;;  %v146_v46 = vpop.f32.mrb[3].mxu0 }
  0xf9   :  { %v149_v47 = vmax.f32 %v144_v43, 0.0 }
  0xfa   :  { %v150_v49 = vpack.c.bf16 %v148_v45, %v148_v45 }
  0xfb   :  { %v151_v48 = vpack.c.bf16 %v149_v47, %v149_v47 }
  0xfd   :  { %319 = vmatprep.mubr.bf16.mxu1 %v151_v48 }
  0xfe   :  { %320 = vmatmul.mubr.bf16.vlgmr.msra.gmra.mrb[0].mxu1 %v150_v49 }
 0x1d1   :  { %v534_v52 = vpop.f32.mrb[0].mxu1 }
 0x1d2   :  { %v535_v54 = vpop.f32.mrb[1].mxu1 }
 0x1d3   :  { %v536_v55 = vadd.f32 %v535_v54, %v534_v52  ;;  %v537_v56 = vpop.f32.mrb[2].mxu1 }
 0x1d4   :  { %v538_v57 = vpop.f32.mrb[3].mxu1 }
 0x1d5   :  { %v322_v58 = vadd.f32 %v536_v55, %v490_v53 }
 0x1d7   :  { %v327_v59 = vmax.f32 %v322_v58, 0.0 }
 0x1d9   :  { %v328_v60 = vpack.c.bf16 %v327_v59, %v327_v59 }
 0x1db   :  { %566 = vmatmul.mubr.bf16.vlgmr.msra.gmra.mrb[4].mxu0 %v328_v60 }
 0x2ae   :  { %v434_v62 = vpop.f32.mrb[4].mxu0 }
 0x2af   :  { %v435_v63 = vadd.f32 %v507_v61, %v434_v62  ;;  %v567_v0 = vpop.f32.mrb[5].mxu0 }
 0x2b0   :  { %v437_v1 = vpop.f32.mrb[6].mxu0 }
 0x2b1   :  { %v440_v3 = vmax.f32 %v435_v63, 0.0  ;;  %v568_v4 = vpop.f32.mrb[7].mxu0 }
 0x2b3   :  { %v448_v5 = vmul.f32 %v516_v2, %v440_v3 }
 0x2b5   :  { %v450_v6 = vsel %vm449_vm3, %v448_v5, 0.0 }
 0x2b6   :  { %451 = vadd.xlane.f32.xlu0 %v450_v6 }
 0x343   :  { %v452_v8 = vpop.xlane.xlu0 %451 }
 0x344   :  { %v460_v9 = vadd.f32 %v517_v7, %v452_v8 }
 0x346   :  { %v462_v10 = vmin.f32 %v460_v9, 20.0  ;;  %vm461_vm6 = vcmp.gt.f32.partialorder %v460_v9, 20.0 }
 0x348   :  { %v463_v11 = vmul.f32 1.442695, %v462_v10 }
 0x34a   :  { %608 = vpow2.f32 %v463_v11 }
 0x354   :  { %v609_v12 = vpop.eup %608 }
 0x355   :  { %v465_v13 = vadd.f32 1.0, %v609_v12  ;;  %v468_v14 = vmul.f32 -0.5, %v609_v12  ;;  %v471_v16 = vand.u32 2147483647, %v609_v12 }
 0x357   :  { %610 = vlog2.f32 %v465_v13  ;;  %v469_v15 = vadd.f32 1.0, %v468_v14  ;;  %vm472_vm4 = vcmp.lt.f32.partialorder %v471_v16, 0.0004427343 }
 0x359   :  { %v470_v19 = vmul.f32 %v609_v12, %v469_v15 }
 0x361   :  { %v611_v17 = vpop.eup %610 }
 0x362   :  { %v467_v18 = vmul.f32 0.6931472, %v611_v17 }
 0x364   :  { %v473_v20 = vsel %vm472_vm4, %v470_v19, %v467_v18 }
 0x365   :  { %v474_v21 = vsel %vm461_vm6, %v460_v9, %v473_v20 }
 0x366   :  { %476 = vst.msk [vmem:[%s776_s9] sm:$0xff] %vm475_vm5, %v474_v21 }
 0x367   :  { %481 = vsyncpa [#allocation4], 1 }

</bundles_post_ra>
